<compile_context>
chip_gen: v7x
topology: tpu7x:2x2x1
jax: 0.10.0
libtpu: 0.0.40
codegen_flags: <defaults>
</compile_context>

<pallas_src>
import functools

import jax
import jax.numpy as jnp
from jax.experimental import pallas as pl
from jax.experimental.pallas import tpu as pltpu


def _round_up(x, m):
    return (x + m - 1) // m * m


def _fused_hypernet_kernel(z_ref, w2_ref, b2_ref, w1_ref, b1_ref, o_ref,
                           hrow_scr, hin_scr, *, in_size, z_dim):
    # z_ref   : (1, z_dim)              VMEM, weights dtype (bf16)
    # w2_ref  : (z_dim, in_size*z_dim)  VMEM, lane-dense, weights dtype
    # b2_ref  : (1, in_size*z_dim)      VMEM, f32
    # w1_ref  : (z_dim, n_pad)          VMEM, radii folded into N + zero pad, weights dtype
    # b1_ref  : (1, n_pad)              VMEM, f32
    # o_ref   : (in_size, n_pad)        VMEM, f32 (lane-dense stores)
    # hrow_scr: (1, in_size*z_dim)      VMEM f32 scratch
    # hin_scr : (in_size, z_dim)        VMEM f32 scratch

    # ---- Stage 1 (MXU, M=1): h_row = z @ w2 + b2  -> (1, in_size*z_dim) f32 ----
    hrow_scr[...] = (
        jnp.dot(z_ref[...], w2_ref[...], preferred_element_type=jnp.float32)
        + b2_ref[...]
    )

    # ---- 2 KiB relayout (1, in*z) -> (in, z) via VMEM scratch (static ref slices,
    #      fully unrolled; in_size is tiny) ----
    for i in range(in_size):
        hin_scr[pl.ds(i, 1), :] = hrow_scr[pl.ds(0, 1), pl.ds(i * z_dim, z_dim)]

    # ---- Stage 2 (MXU): (in_size, z_dim) @ (z_dim, n_pad) + b1 -> lane-dense output ----
    h_in = hin_scr[...].astype(w1_ref.dtype)
    o_ref[...] = (
        jnp.dot(h_in, w1_ref[...], preferred_element_type=jnp.float32) + b1_ref[...]
    )


class HyperNetworkPallas:
    def __init__(self, key, f_size=3, z_dim=32, out_size=16, in_size=16,
                 num_radii=2, weights_dtype=jnp.bfloat16):
        self.f_size = f_size
        self.z_dim = z_dim
        self.out_size = out_size
        self.in_size = in_size
        self.num_radii = num_radii
        self.weights_dtype = weights_dtype

        out_flat = out_size * f_size * f_size
        self.out_flat = out_flat

        k1, k2, k3, k4 = jax.random.split(key, 4)
        # Master parameters, same shapes as the PyTorch module (fmod(randn, 2) init).
        self.w1 = jnp.fmod(
            jax.random.normal(k1, (num_radii, z_dim, out_flat), jnp.float32), 2.0)
        self.b1 = jnp.fmod(
            jax.random.normal(k2, (1, out_flat), jnp.float32), 2.0)
        self.w2 = jnp.fmod(
            jax.random.normal(k3, (z_dim, in_size * z_dim), jnp.float32), 2.0)
        self.b2 = jnp.fmod(
            jax.random.normal(k4, (in_size * z_dim,), jnp.float32), 2.0)

        # ---- static weight re-layouts (done once; zero per-call cost) ----
        n_fold = num_radii * out_flat
        self.n_fold = n_fold
        self.n_pad = _round_up(n_fold, 128)                # lane-dense output width

        # w2 stays lane-dense 2-D; stored bf16 (DMA bytes halved, MXU-native input).
        self._w2_kd = self.w2.astype(weights_dtype)        # (z_dim, in_size*z_dim)
        self._b2_row = self.b2.reshape(1, in_size * z_dim) # f32

        # Fold radii into the GEMM N dimension; zero-pad to a multiple of 128.
        w1_fold = jnp.transpose(self.w1, (1, 0, 2)).reshape(z_dim, n_fold)
        b1_fold = jnp.tile(self.b1, (1, num_radii))
        self._w1_fp = jnp.pad(
            w1_fold, ((0, 0), (0, self.n_pad - n_fold))).astype(weights_dtype)
        self._b1_fp = jnp.pad(
            b1_fold, ((0, 0), (0, self.n_pad - n_fold)))   # f32

        self._forward = jax.jit(self._forward_impl)

    # ---- fused, gridless Pallas kernel call ----
    def _pallas_matmuls(self, zq):
        z_dim, in_size, n_pad = self.z_dim, self.in_size, self.n_pad
        in_z = in_size * z_dim
        w_bytes = jnp.dtype(self.weights_dtype).itemsize
        flops = 2 * 1 * z_dim * in_z + 2 * in_size * z_dim * n_pad
        bytes_accessed = (
            z_dim * w_bytes                    # z
            + z_dim * in_z * w_bytes           # w2
            + in_z * 4                         # b2
            + z_dim * n_pad * w_bytes          # w1 (folded + padded)
            + n_pad * 4                        # b1
            + in_size * n_pad * 4              # output
        )
        return pl.pallas_call(
            functools.partial(_fused_hypernet_kernel, in_size=in_size, z_dim=z_dim),
            out_shape=jax.ShapeDtypeStruct((in_size, n_pad), jnp.float32),
            in_specs=[
                pl.BlockSpec((1, z_dim), lambda: (0, 0)),          # z (bf16)
                pl.BlockSpec((z_dim, in_z), lambda: (0, 0)),       # w2 lane-dense (bf16)
                pl.BlockSpec((1, in_z), lambda: (0, 0)),           # b2 (f32)
                pl.BlockSpec((z_dim, n_pad), lambda: (0, 0)),      # w1 folded+pad (bf16)
                pl.BlockSpec((1, n_pad), lambda: (0, 0)),          # b1 folded+pad (f32)
            ],
            out_specs=pl.BlockSpec((in_size, n_pad), lambda: (0, 0)),
            scratch_shapes=[
                pltpu.VMEM((1, in_z), jnp.float32),                # h_row
                pltpu.VMEM((in_size, z_dim), jnp.float32),         # h_in
            ],
            cost_estimate=pl.CostEstimate(
                flops=flops, transcendentals=0, bytes_accessed=bytes_accessed),
        )(zq, self._w2_kd, self._b2_row, self._w1_fp, self._b1_fp)

    def _forward_impl(self, z):
        z_dim, in_size, out_size, f = (self.z_dim, self.in_size, self.out_size,
                                       self.f_size)
        num_radii, out_flat, n_fold = self.num_radii, self.out_flat, self.n_fold

        zq = z.reshape(1, z_dim).astype(self.weights_dtype)
        out2d = self._pallas_matmuls(zq)                          # (in_size, n_pad) f32

        # Tiny glue (fused under jit): drop lane padding, reorder to the torch layout.
        h_fold = out2d[:, :n_fold]                                # (in, nr*out_flat)
        h_final = jnp.transpose(
            h_fold.reshape(in_size, num_radii, out_flat), (1, 0, 2))  # (nr, in, out_flat)
        kernel = h_final.reshape(num_radii, out_size, in_size, f, f)  # torch .view
        return jnp.transpose(kernel, (1, 2, 0, 3, 4))                 # .permute(1,2,0,3,4)

    def __call__(self, z):
        return self._forward(z)

    # pure-JAX reference mirroring the PyTorch forward (independent of the fold/pad
    # layout used by the kernel). With match_kernel_rounding=True, weights / z / h_in
    # are rounded to bf16 exactly as the kernel does, so it validates the kernel math
    # tightly; with False it is the exact f32 module semantics.
    def reference(self, z, match_kernel_rounding=False):
        hi = jax.lax.Precision.HIGHEST
        z_dim, in_size, out_size, f = (self.z_dim, self.in_size, self.out_size,
                                       self.f_size)
        num_radii = self.num_radii
        w1, w2, b1, b2 = self.w1, self.w2, self.b1, self.b2
        zr = z.reshape(1, z_dim).astype(jnp.float32)
        if match_kernel_rounding:
            q = lambda a: a.astype(self.weights_dtype).astype(jnp.float32)
            w1, w2, zr = q(w1), q(w2), q(zr)
        h_in = (jnp.dot(zr, w2, precision=hi) + b2).reshape(in_size, z_dim)
        if match_kernel_rounding:
            h_in = h_in.astype(self.weights_dtype).astype(jnp.float32)
        h_final = jnp.einsum("iz,rzo->rio", h_in, w1, precision=hi) + b1[None]
        kernel = h_final.reshape(num_radii, out_size, in_size, f, f)
        return jnp.transpose(kernel, (1, 2, 0, 3, 4))


if __name__ == "__main__":
    key = jax.random.PRNGKey(0)
    pkey, zkey = jax.random.split(key)

    # Small, module-consistent sizes.
    net = HyperNetworkPallas(pkey, f_size=3, z_dim=32, out_size=16, in_size=16,
                             num_radii=2)
    z = jax.random.normal(zkey, (1, net.z_dim), jnp.float32)

    out = jax.block_until_ready(net(z))

    assert out.shape == (net.out_size, net.in_size, net.num_radii,
                         net.f_size, net.f_size), out.shape

    # Tight check: same math the kernel performs (bf16 weights, f32 accumulation).
    ref_q = net.reference(z, match_kernel_rounding=True)
    assert jnp.allclose(out, ref_q, atol=2e-3, rtol=2e-3), float(
        jnp.max(jnp.abs(out - ref_q)))

    # Loose check vs. the exact f32 module semantics (bounds bf16 weight rounding).
    ref_f32 = net.reference(z, match_kernel_rounding=False)
    assert jnp.allclose(out, ref_f32, atol=0.6, rtol=0.05), float(
        jnp.max(jnp.abs(out - ref_f32)))

    print("KERNEL_OK")
</pallas_src>

<mosaic_0001>
module attributes {stable_mosaic.version = 11 : i64} {
  func.func @_fused_hypernet_kernel(%arg0: memref<1x32xbf16, #tpu.memory_space<vmem>>, %arg1: memref<32x512xbf16, #tpu.memory_space<vmem>>, %arg2: memref<1x512xf32, #tpu.memory_space<vmem>>, %arg3: memref<32x384xbf16, #tpu.memory_space<vmem>>, %arg4: memref<1x384xf32, #tpu.memory_space<vmem>>, %arg5: memref<16x384xf32, #tpu.memory_space<vmem>>, %arg6: memref<1x512xf32, #tpu.memory_space<vmem>>, %arg7: memref<16x32xf32, #tpu.memory_space<vmem>>) attributes {dimension_semantics = [], scalar_prefetch = 0 : i64, scratch_operands = 2 : i64, tpu.core_type = #tpu.core_type<tc>} {
    %c0 = arith.constant 0 : index
    %c0_0 = arith.constant 0 : index
    %0 = vector.load %arg0[%c0, %c0_0] : memref<1x32xbf16, #tpu.memory_space<vmem>>, vector<1x32xbf16>
    %c0_1 = arith.constant 0 : index
    %c0_2 = arith.constant 0 : index
    %1 = vector.load %arg1[%c0_1, %c0_2] : memref<32x512xbf16, #tpu.memory_space<vmem>>, vector<32x512xbf16>
    %cst = arith.constant dense<0.000000e+00> : vector<1x512xf32>
    %2 = tpu.matmul %0, %1, %cst {dimension_numbers = #tpu.dot_dimension_numbers<[1], [0], [0], [1], [0, 0, 1, 1], [], []>} : vector<1x32xbf16>, vector<32x512xbf16>, vector<1x512xf32> -> vector<1x512xf32>
    %c0_3 = arith.constant 0 : index
    %c0_4 = arith.constant 0 : index
    %3 = vector.load %arg2[%c0_3, %c0_4] : memref<1x512xf32, #tpu.memory_space<vmem>>, vector<1x512xf32>
    %4 = arith.addf %2, %3 : vector<1x512xf32>
    %c0_5 = arith.constant 0 : index
    %c0_6 = arith.constant 0 : index
    %5 = vector.load %arg6[%c0_5, %c0_6] : memref<1x512xf32, #tpu.memory_space<vmem>>, vector<1x512xf32>
    tpu.vector_store %arg6[%c0_5, %c0_6], %4 {strides = array<i32>} : memref<1x512xf32, #tpu.memory_space<vmem>>, vector<1x512xf32>,
    %c0_7 = arith.constant 0 : index
    %c0_8 = arith.constant 0 : index
    %6 = vector.load %arg6[%c0_7, %c0_8] : memref<1x512xf32, #tpu.memory_space<vmem>>, vector<1x32xf32>
    %c0_9 = arith.constant 0 : index
    %c0_10 = arith.constant 0 : index
    %7 = vector.load %arg7[%c0_9, %c0_10] : memref<16x32xf32, #tpu.memory_space<vmem>>, vector<1x32xf32>
    tpu.vector_store %arg7[%c0_9, %c0_10], %6 {strides = array<i32>} : memref<16x32xf32, #tpu.memory_space<vmem>>, vector<1x32xf32>,
    %c0_11 = arith.constant 0 : index
    %c32 = arith.constant 32 : index
    %8 = vector.load %arg6[%c0_11, %c32] : memref<1x512xf32, #tpu.memory_space<vmem>>, vector<1x32xf32>
    %c1 = arith.constant 1 : index
    %c0_12 = arith.constant 0 : index
    %9 = vector.load %arg7[%c1, %c0_12] : memref<16x32xf32, #tpu.memory_space<vmem>>, vector<1x32xf32>
    tpu.vector_store %arg7[%c1, %c0_12], %8 {strides = array<i32>} : memref<16x32xf32, #tpu.memory_space<vmem>>, vector<1x32xf32>,
    %c0_13 = arith.constant 0 : index
    %c64 = arith.constant 64 : index
    %10 = vector.load %arg6[%c0_13, %c64] : memref<1x512xf32, #tpu.memory_space<vmem>>, vector<1x32xf32>
    %c2 = arith.constant 2 : index
    %c0_14 = arith.constant 0 : index
    %11 = vector.load %arg7[%c2, %c0_14] : memref<16x32xf32, #tpu.memory_space<vmem>>, vector<1x32xf32>
    tpu.vector_store %arg7[%c2, %c0_14], %10 {strides = array<i32>} : memref<16x32xf32, #tpu.memory_space<vmem>>, vector<1x32xf32>,
    %c0_15 = arith.constant 0 : index
    %c96 = arith.constant 96 : index
    %12 = vector.load %arg6[%c0_15, %c96] : memref<1x512xf32, #tpu.memory_space<vmem>>, vector<1x32xf32>
    %c3 = arith.constant 3 : index
    %c0_16 = arith.constant 0 : index
    %13 = vector.load %arg7[%c3, %c0_16] : memref<16x32xf32, #tpu.memory_space<vmem>>, vector<1x32xf32>
    tpu.vector_store %arg7[%c3, %c0_16], %12 {strides = array<i32>} : memref<16x32xf32, #tpu.memory_space<vmem>>, vector<1x32xf32>,
    %c0_17 = arith.constant 0 : index
    %c128 = arith.constant 128 : index
    %14 = vector.load %arg6[%c0_17, %c128] : memref<1x512xf32, #tpu.memory_space<vmem>>, vector<1x32xf32>
    %c4 = arith.constant 4 : index
    %c0_18 = arith.constant 0 : index
    %15 = vector.load %arg7[%c4, %c0_18] : memref<16x32xf32, #tpu.memory_space<vmem>>, vector<1x32xf32>
    tpu.vector_store %arg7[%c4, %c0_18], %14 {strides = array<i32>} : memref<16x32xf32, #tpu.memory_space<vmem>>, vector<1x32xf32>,
    %c0_19 = arith.constant 0 : index
    %c160 = arith.constant 160 : index
    %16 = vector.load %arg6[%c0_19, %c160] : memref<1x512xf32, #tpu.memory_space<vmem>>, vector<1x32xf32>
    %c5 = arith.constant 5 : index
    %c0_20 = arith.constant 0 : index
    %17 = vector.load %arg7[%c5, %c0_20] : memref<16x32xf32, #tpu.memory_space<vmem>>, vector<1x32xf32>
    tpu.vector_store %arg7[%c5, %c0_20], %16 {strides = array<i32>} : memref<16x32xf32, #tpu.memory_space<vmem>>, vector<1x32xf32>,
    %c0_21 = arith.constant 0 : index
    %c192 = arith.constant 192 : index
    %18 = vector.load %arg6[%c0_21, %c192] : memref<1x512xf32, #tpu.memory_space<vmem>>, vector<1x32xf32>
    %c6 = arith.constant 6 : index
    %c0_22 = arith.constant 0 : index
    %19 = vector.load %arg7[%c6, %c0_22] : memref<16x32xf32, #tpu.memory_space<vmem>>, vector<1x32xf32>
    tpu.vector_store %arg7[%c6, %c0_22], %18 {strides = array<i32>} : memref<16x32xf32, #tpu.memory_space<vmem>>, vector<1x32xf32>,
    %c0_23 = arith.constant 0 : index
    %c224 = arith.constant 224 : index
    %20 = vector.load %arg6[%c0_23, %c224] : memref<1x512xf32, #tpu.memory_space<vmem>>, vector<1x32xf32>
    %c7 = arith.constant 7 : index
    %c0_24 = arith.constant 0 : index
    %21 = vector.load %arg7[%c7, %c0_24] : memref<16x32xf32, #tpu.memory_space<vmem>>, vector<1x32xf32>
    tpu.vector_store %arg7[%c7, %c0_24], %20 {strides = array<i32>} : memref<16x32xf32, #tpu.memory_space<vmem>>, vector<1x32xf32>,
    %c0_25 = arith.constant 0 : index
    %c256 = arith.constant 256 : index
    %22 = vector.load %arg6[%c0_25, %c256] : memref<1x512xf32, #tpu.memory_space<vmem>>, vector<1x32xf32>
    %c8 = arith.constant 8 : index
    %c0_26 = arith.constant 0 : index
    %23 = vector.load %arg7[%c8, %c0_26] : memref<16x32xf32, #tpu.memory_space<vmem>>, vector<1x32xf32>
    tpu.vector_store %arg7[%c8, %c0_26], %22 {strides = array<i32>} : memref<16x32xf32, #tpu.memory_space<vmem>>, vector<1x32xf32>,
    %c0_27 = arith.constant 0 : index
    %c288 = arith.constant 288 : index
    %24 = vector.load %arg6[%c0_27, %c288] : memref<1x512xf32, #tpu.memory_space<vmem>>, vector<1x32xf32>
    %c9 = arith.constant 9 : index
    %c0_28 = arith.constant 0 : index
    %25 = vector.load %arg7[%c9, %c0_28] : memref<16x32xf32, #tpu.memory_space<vmem>>, vector<1x32xf32>
    tpu.vector_store %arg7[%c9, %c0_28], %24 {strides = array<i32>} : memref<16x32xf32, #tpu.memory_space<vmem>>, vector<1x32xf32>,
    %c0_29 = arith.constant 0 : index
    %c320 = arith.constant 320 : index
    %26 = vector.load %arg6[%c0_29, %c320] : memref<1x512xf32, #tpu.memory_space<vmem>>, vector<1x32xf32>
    %c10 = arith.constant 10 : index
    %c0_30 = arith.constant 0 : index
    %27 = vector.load %arg7[%c10, %c0_30] : memref<16x32xf32, #tpu.memory_space<vmem>>, vector<1x32xf32>
    tpu.vector_store %arg7[%c10, %c0_30], %26 {strides = array<i32>} : memref<16x32xf32, #tpu.memory_space<vmem>>, vector<1x32xf32>,
    %c0_31 = arith.constant 0 : index
    %c352 = arith.constant 352 : index
    %28 = vector.load %arg6[%c0_31, %c352] : memref<1x512xf32, #tpu.memory_space<vmem>>, vector<1x32xf32>
    %c11 = arith.constant 11 : index
    %c0_32 = arith.constant 0 : index
    %29 = vector.load %arg7[%c11, %c0_32] : memref<16x32xf32, #tpu.memory_space<vmem>>, vector<1x32xf32>
    tpu.vector_store %arg7[%c11, %c0_32], %28 {strides = array<i32>} : memref<16x32xf32, #tpu.memory_space<vmem>>, vector<1x32xf32>,
    %c0_33 = arith.constant 0 : index
    %c384 = arith.constant 384 : index
    %30 = vector.load %arg6[%c0_33, %c384] : memref<1x512xf32, #tpu.memory_space<vmem>>, vector<1x32xf32>
    %c12 = arith.constant 12 : index
    %c0_34 = arith.constant 0 : index
    %31 = vector.load %arg7[%c12, %c0_34] : memref<16x32xf32, #tpu.memory_space<vmem>>, vector<1x32xf32>
    tpu.vector_store %arg7[%c12, %c0_34], %30 {strides = array<i32>} : memref<16x32xf32, #tpu.memory_space<vmem>>, vector<1x32xf32>,
    %c0_35 = arith.constant 0 : index
    %c416 = arith.constant 416 : index
    %32 = vector.load %arg6[%c0_35, %c416] : memref<1x512xf32, #tpu.memory_space<vmem>>, vector<1x32xf32>
    %c13 = arith.constant 13 : index
    %c0_36 = arith.constant 0 : index
    %33 = vector.load %arg7[%c13, %c0_36] : memref<16x32xf32, #tpu.memory_space<vmem>>, vector<1x32xf32>
    tpu.vector_store %arg7[%c13, %c0_36], %32 {strides = array<i32>} : memref<16x32xf32, #tpu.memory_space<vmem>>, vector<1x32xf32>,
    %c0_37 = arith.constant 0 : index
    %c448 = arith.constant 448 : index
    %34 = vector.load %arg6[%c0_37, %c448] : memref<1x512xf32, #tpu.memory_space<vmem>>, vector<1x32xf32>
    %c14 = arith.constant 14 : index
    %c0_38 = arith.constant 0 : index
    %35 = vector.load %arg7[%c14, %c0_38] : memref<16x32xf32, #tpu.memory_space<vmem>>, vector<1x32xf32>
    tpu.vector_store %arg7[%c14, %c0_38], %34 {strides = array<i32>} : memref<16x32xf32, #tpu.memory_space<vmem>>, vector<1x32xf32>,
    %c0_39 = arith.constant 0 : index
    %c480 = arith.constant 480 : index
    %36 = vector.load %arg6[%c0_39, %c480] : memref<1x512xf32, #tpu.memory_space<vmem>>, vector<1x32xf32>
    %c15 = arith.constant 15 : index
    %c0_40 = arith.constant 0 : index
    %37 = vector.load %arg7[%c15, %c0_40] : memref<16x32xf32, #tpu.memory_space<vmem>>, vector<1x32xf32>
    tpu.vector_store %arg7[%c15, %c0_40], %36 {strides = array<i32>} : memref<16x32xf32, #tpu.memory_space<vmem>>, vector<1x32xf32>,
    %c0_41 = arith.constant 0 : index
    %c0_42 = arith.constant 0 : index
    %38 = vector.load %arg7[%c0_41, %c0_42] : memref<16x32xf32, #tpu.memory_space<vmem>>, vector<16x32xf32>
    %39 = arith.truncf %38 : vector<16x32xf32> to vector<16x32xbf16>
    %c0_43 = arith.constant 0 : index
    %c0_44 = arith.constant 0 : index
    %40 = vector.load %arg3[%c0_43, %c0_44] : memref<32x384xbf16, #tpu.memory_space<vmem>>, vector<32x384xbf16>
    %cst_45 = arith.constant dense<0.000000e+00> : vector<16x384xf32>
    %41 = tpu.matmul %39, %40, %cst_45 {dimension_numbers = #tpu.dot_dimension_numbers<[1], [0], [0], [1], [0, 0, 1, 1], [], []>} : vector<16x32xbf16>, vector<32x384xbf16>, vector<16x384xf32> -> vector<16x384xf32>
    %c0_46 = arith.constant 0 : index
    %c0_47 = arith.constant 0 : index
    %42 = vector.load %arg4[%c0_46, %c0_47] : memref<1x384xf32, #tpu.memory_space<vmem>>, vector<1x384xf32>
    %43 = vector.broadcast %42 : vector<1x384xf32> to vector<16x384xf32>
    %44 = arith.addf %41, %43 : vector<16x384xf32>
    %c0_48 = arith.constant 0 : index
    %c0_49 = arith.constant 0 : index
    %45 = vector.load %arg5[%c0_48, %c0_49] : memref<16x384xf32, #tpu.memory_space<vmem>>, vector<16x384xf32>
    tpu.vector_store %arg5[%c0_48, %c0_49], %44 {strides = array<i32>} : memref<16x384xf32, #tpu.memory_space<vmem>>, vector<16x384xf32>,
    return
  }
}

</mosaic_0001>

<bundles_post_ra>
// kernel: _forward_impl.1
= control target key start
LH: loop header
LB: loop body
LE: loop exit
PB: predicated region body
PF: predicated region fallthrough
CT: control target
= control target key end

     0   :  { %v566_v1 = vmov 0   ;;  %vm92_vm0 = vcmask 261120   ;;  %v72_v10 = vlaneseq  ;;  %v567_v16 = vmov 1966171168   ;;  %s570_s12 = smov 64   ;;  %s715_s1 = inlined_call_operand.vmem [shape: bf16[32,512], index: 1, kind: input, shape index: {}]   ;;  %s716_s0 = inlined_call_operand.vmem [shape: bf16[1,32], index: 0, kind: input, shape index: {}]   ;;  %s717_s2 = inlined_call_operand.vmem [shape: f32[1,512], index: 2, kind: input, shape index: {}]   ;;  %s718_s3 = inlined_call_operand.vmem [shape: bf16[32,384], index: 3, kind: input, shape index: {}]   ;;  %s719_s4 = inlined_call_operand.vmem [shape: f32[1,384], index: 4, kind: input, shape index: {}]   ;;  %s720_s5 = inlined_call_operand.vmem [shape: f32[16,384], index: 5, kind: output, shape index: {}]  }
   0x1   :  { %v546_v0 = vld [vmem:[%s715_s1 + $0x4] ss:$16 sps:$4 sm:$0xff]   ;;  %128 = vmatprep.mubr.bf16.mxu0 %v566_v1  ;;  %169 = vmatprep.mubr.bf16.mxu1 %v566_v1  ;;  %v548_v2 = vld [vmem:[%s715_s1 + $0xc] ss:$16 sps:$4 sm:$0xff]   ;;  %v550_v3 = vld [vmem:[%s715_s1] ss:$16 sps:$4 sm:$0xff]   ;;  %v185_v17 = vunpack.c.l.s4 %v567_v16 }
   0x2   :  { %96 = vmatprep.subr.bf16.mxu0 %v546_v0  ;;  %v551_v4 = vld [vmem:[%s715_s1 + $0x8] ss:$16 sps:$4 sm:$0xff]   ;;  %137 = vmatprep.subr.bf16.mxu1 %v548_v2  ;;  %v552_v5 = vld [vmem:[%s715_s1 + $0x24] ss:$16 sps:$4 sm:$0xff]   ;;  %v554_v6 = vld [vmem:[%s715_s1 + $0x2c] ss:$16 sps:$4 sm:$0xff]  }
   0x3   :  { %97 = vmatpush1.bf16.msra.mxu0 %v550_v3  ;;  %138 = vmatpush1.bf16.msra.mxu1 %v551_v4  ;;  %v556_v7 = vld [vmem:[%s715_s1 + $0x20] ss:$16 sps:$4 sm:$0xff]   ;;  %v557_v8 = vld [vmem:[%s715_s1 + $0x28] ss:$16 sps:$4 sm:$0xff]   ;;  %v632_v11 = vshrl.u32 %v72_v10, 7  ;;  %v186_v22 = vunpack.c.0.s8 %v185_v17  ;;  %vm209_vm1 = vcmp.lt.s32.totalorder %v72_v10, 512 }
   0x4   :  { %98 = vmatprep.subr.bf16.mxu0 %v552_v5  ;;  %139 = vmatprep.subr.bf16.mxu1 %v554_v6  ;;  %v21_v9 = vld [vmem:[%s716_s0] sm:$0x1]  ;;  %vm213_vm2 = vcmask 253952   ;;  %s568_s0 = smov 32   ;;  %v560_v50 = vld [vmem:[%s718_s3 + $0x4] ss:$12 sps:$4 sm:$0xff]  }
   0x5   :  { %v74_v12 = vsub.s32 0, %v632_v11  ;;  %v82_v13 = vsub.s32 2, %v632_v11  ;;  %v30_v14 = vld [vmem:[%s717_s2] sm:$0xf]  ;;  %v78_v15 = vsub.s32 1, %v632_v11  ;;  %v86_v18 = vsub.s32 3, %v632_v11 }
   0x6   :  { %v189_v31 = vsub.s32 %v186_v22, %v632_v11  ;;  %s569_s2 = smov 96   ;;  %v558_v49 = vld [vmem:[%s718_s3] ss:$12 sps:$4 sm:$0xff]   ;;  %v571_v51 = vmov 0.0   ;;  %vm572_vm3 = vmmov 0  }
   0x7   :  { %99 = vmatpush1.bf16.msra.mxu0 %v556_v7  ;;  %140 = vmatpush1.bf16.msra.mxu1 %v557_v8  ;;  %v75_v19 = vrot.slane %v30_v14, %v74_v12  ;;  %v83_v20 = vrot.slane %v30_v14, %v82_v13  ;;  %v79_v21 = vrot.slane %v30_v14, %v78_v15  ;;  %v561_v52 = vld [vmem:[%s718_s3 + $0x8] ss:$12 sps:$4 sm:$0xff]   ;;  %v562_v55 = vld [vmem:[%s718_s3 + $0x18] ss:$12 sps:$4 sm:$0xff]   ;;  %v565_v56 = vld [vmem:[%s718_s3 + $0x20] ss:$12 sps:$4 sm:$0xff]  }
   0x8   :  { %v87_v23 = vrot.slane %v30_v14, %v86_v18  ;;  %531 = vmatprep.subr.bf16.mxu1 %v571_v51  ;;  %404 = vmatprep.subr.bf16.mxu0 %v560_v50  ;;  %v564_v54 = vld [vmem:[%s718_s3 + $0x1c] ss:$12 sps:$4 sm:$0xff]  }
   0xa   :  { %506 = vmatmul.mubr.msk.bf16.vlgmr.msra.gmra.mrb[0].mxu0 %vm92_vm0, %v21_v9  ;;  %507 = vmatmul.mubr.msk.bf16.vlgmr.msra.gmra.mrb[0].mxu1 %vm92_vm0, %v21_v9  ;;  %v352_v9 = vld [vmem:[%s719_s4] sm:$0x7] }
   0xb   :  { %436 = vmatprep.mubr.bf16.mxu0 %v566_v1  ;;  %535 = vmatprep.mubr.msk.bf16.mxu1 %vm572_vm3, %v571_v51  ;;  %v357_v10 = vrot.slane %v352_v9, %v74_v12  ;;  %v365_v14 = vrot.slane %v352_v9, %v82_v13  ;;  %v361_v16 = vrot.slane %v352_v9, %v78_v15 }
   0xc   :  { %405 = vmatpush1.bf16.msra.mxu0 %v558_v49  ;;  %532 = vmatpush3.bf16.msra.mxu1 %v561_v52 }
   0xd   :  { %406 = vmatprep.subr.bf16.mxu0 %v564_v54  ;;  %533 = vmatprep.subr.bf16.mxu1 %v571_v51 }
  0x10   :  { %407 = vmatpush1.bf16.msra.mxu0 %v562_v55  ;;  %534 = vmatpush3.bf16.msra.mxu1 %v565_v56 }
  0xdd   :  { %v130_v24 = vpop.f32.mrb[0].mxu0  ;;  %v171_v25 = vpop.f32.mrb[0].mxu1 }
  0xde   :  { %v131_v26 = vadd.f32 %v130_v24, %v75_v19  ;;  %v172_v27 = vadd.f32 %v171_v25, %v83_v20  ;;  %v132_v28 = vpop.f32.mrb[1].mxu0  ;;  %v173_v29 = vpop.f32.mrb[1].mxu1 }
  0xdf   :  { %v133_v30 = vadd.f32 %v132_v28, %v79_v21  ;;  %v174_v32 = vadd.f32 %v173_v29, %v87_v23  ;;  %v134_v33 = vpop.f32.mrb[2].mxu0  ;;  %v175_v34 = vpop.f32.mrb[2].mxu1 }
  0xe0   :  { %v135_v35 = vpop.f32.mrb[3].mxu0  ;;  %v176_v36 = vpop.f32.mrb[3].mxu1 }
  0xe1   :  { %v182_v37 = vcombine.low %v131_v26, %v133_v30  ;;  %v183_v38 = vcombine.low %v172_v27, %v174_v32 }
  0xe3   :  { %v190_v39 = vrot.slane %v182_v37, %v189_v31  ;;  %v197_v40 = vrot.slane %v183_v38, %v189_v31 }
  0xe5   :  { %v198_v41 = vcombine.low %v190_v39, %v197_v40 }
  0xe7   :  { %v205_v42 = vrot.slane %v198_v41, %v189_v31 }
  0xe9   :  { %211 = vst.msk [vmem:[#allocation2] sm:$0xf] %vm209_vm1, %v205_v42 }
  0xf0   :  { %v212_v43 = vld [vmem:[#allocation2] sm:$0x1]  ;;  %v245_v44 = vld [vmem:[#allocation2 + $0x1] sm:$0x1]  ;;  %v277_v45 = vld [vmem:[#allocation2 + $0x2] sm:$0x1] }
  0xf1   :  { %214 = vst.msk [vmem:[#allocation3] sm:$0x1] %vm213_vm2, %v212_v43  ;;  %246 = vst.msk [vmem:[#allocation3 + $0x4] sm:$0x1] %vm213_vm2, %v245_v44  ;;  %v309_v46 = vld [vmem:[#allocation2 + $0x3] sm:$0x1] }
  0xf2   :  { %278 = vst.msk [vmem:[#allocation3 + $0x8] sm:$0x1] %vm213_vm2, %v277_v45  ;;  %v510_v47 = vld [vmem:[#allocation2] ss:$0 sm:$0xff]  ;;  %310 = vst.msk [vmem:[#allocation3 + $0xc] sm:$0x1] %vm213_vm2, %v309_v46 }
  0xf3   :  { %241 = vrot.lane.b32.xlu1 %v510_v47, %s568_s0  ;;  %221 = vrot.lane.b32.xlu0 %v510_v47, %s569_s2  ;;  %v511_v48 = vld [vmem:[#allocation2 + $0x1] ss:$0 sm:$0xff]  ;;  %v515_v53 = vld [vmem:[#allocation2 + $0x2] ss:$0 sm:$0xff]  ;;  %v517_v57 = vld [vmem:[#allocation2 + $0x3] ss:$0 sm:$0xff] }
  0xf7   :  { %253 = vrot.lane.b32.xlu1 %v511_v48, %s569_s2  ;;  %231 = vrot.lane.b32.xlu0 %v510_v47, %s570_s12 }
  0xfb   :  { %273 = vrot.lane.b32.xlu1 %v511_v48, %s568_s0  ;;  %263 = vrot.lane.b32.xlu0 %v511_v48, %s570_s12 }
  0xff   :  { %295 = vrot.lane.b32.xlu1 %v515_v53, %s570_s12  ;;  %285 = vrot.lane.b32.xlu0 %v515_v53, %s569_s2 }
 0x103   :  { %317 = vrot.lane.b32.xlu1 %v517_v57, %s569_s2  ;;  %305 = vrot.lane.b32.xlu0 %v515_v53, %s568_s0 }
 0x107   :  { %337 = vrot.lane.b32.xlu1 %v517_v57, %s568_s0  ;;  %327 = vrot.lane.b32.xlu0 %v517_v57, %s570_s12 }
 0x165   :  { %v242_v58 = vpop.permute.xlu1 %241  ;;  %v222_v59 = vpop.permute.xlu0 %221 }
 0x166   :  { %244 = vst.msk [vmem:[#allocation3 + $0x3] sm:$0x1] %vm213_vm2, %v242_v58  ;;  %224 = vst.msk [vmem:[#allocation3 + $0x1] sm:$0x1] %vm213_vm2, %v222_v59 }
 0x169   :  { %v254_v60 = vpop.permute.xlu1 %253  ;;  %v232_v61 = vpop.permute.xlu0 %231 }
 0x16a   :  { %256 = vst.msk [vmem:[#allocation3 + $0x5] sm:$0x1] %vm213_vm2, %v254_v60  ;;  %234 = vst.msk [vmem:[#allocation3 + $0x2] sm:$0x1] %vm213_vm2, %v232_v61 }
 0x16d   :  { %v274_v62 = vpop.permute.xlu1 %273  ;;  %v264_v63 = vpop.permute.xlu0 %263 }
 0x16e   :  { %276 = vst.msk [vmem:[#allocation3 + $0x7] sm:$0x1] %vm213_vm2, %v274_v62  ;;  %266 = vst.msk [vmem:[#allocation3 + $0x6] sm:$0x1] %vm213_vm2, %v264_v63 }
 0x171   :  { %v296_v0 = vpop.permute.xlu1 %295  ;;  %v286_v1 = vpop.permute.xlu0 %285 }
 0x172   :  { %298 = vst.msk [vmem:[#allocation3 + $0xa] sm:$0x1] %vm213_vm2, %v296_v0  ;;  %288 = vst.msk [vmem:[#allocation3 + $0x9] sm:$0x1] %vm213_vm2, %v286_v1 }
 0x175   :  { %v318_v2 = vpop.permute.xlu1 %317  ;;  %v306_v3 = vpop.permute.xlu0 %305  ;;  %v341_v6 = vld [vmem:[#allocation3] sm:$0xff] }
 0x176   :  { %320 = vst.msk [vmem:[#allocation3 + $0xd] sm:$0x1] %vm213_vm2, %v318_v2  ;;  %308 = vst.msk [vmem:[#allocation3 + $0xb] sm:$0x1] %vm213_vm2, %v306_v3 }
 0x179   :  { %v338_v4 = vpop.permute.xlu1 %337  ;;  %v328_v5 = vpop.permute.xlu0 %327 }
 0x17a   :  { %340 = vst.msk [vmem:[#allocation3 + $0xf] sm:$0x1] %vm213_vm2, %v338_v4  ;;  %330 = vst.msk [vmem:[#allocation3 + $0xe] sm:$0x1] %vm213_vm2, %v328_v5 }
 0x181   :  { %v342_v7 = vld [vmem:[#allocation3 + $0x8] sm:$0xff] }
 0x182   :  { %v343_v8 = vpack.c.bf16 %v342_v7, %v341_v6 }
 0x184   :  { %526 = vmatmul.mubr.msk.bf16.vlgmr.msra.gmra.mrb[4].mxu0 %vm92_vm0, %v343_v8  ;;  %536 = vmatmul.mubr.msk.bf16.vlgmr.msra.gmra.mrb[4].mxu1 %vm92_vm0, %v343_v8 }
 0x257   :  { %v438_v17 = vpop.f32.mrb[4].mxu0  ;;  %v481_v18 = vpop.f32.mrb[4].mxu1 }
 0x258   :  { %v439_v19 = vadd.f32 %v438_v17, %v357_v10  ;;  %v482_v20 = vadd.f32 %v481_v18, %v365_v14  ;;  %v440_v21 = vpop.f32.mrb[5].mxu0  ;;  %v537_v22 = vpop.f32.mrb[5].mxu1 }
 0x259   :  { %v441_v23 = vadd.f32 %v440_v21, %v361_v16  ;;  %v442_v24 = vpop.f32.mrb[6].mxu0  ;;  %v484_v25 = vpop.f32.mrb[6].mxu1 }
 0x25a   :  { %488 = vst [vmem:[%s720_s5] sm:$0xff] %v439_v19  ;;  %490 = vst [vmem:[%s720_s5 + $0x10] sm:$0xff] %v482_v20  ;;  %v443_v12 = vadd.f32 %v442_v24, %v357_v10  ;;  %v485_v11 = vadd.f32 %v484_v25, %v365_v14  ;;  %v444_v13 = vpop.f32.mrb[7].mxu0  ;;  %v538_v15 = vpop.f32.mrb[7].mxu1 }
 0x25b   :  { %489 = vst [vmem:[%s720_s5 + $0x8] sm:$0xff] %v441_v23  ;;  %v445_v26 = vadd.f32 %v444_v13, %v361_v16 }
 0x25c   :  { %491 = vst [vmem:[%s720_s5 + $0x18] sm:$0xff] %v443_v12  ;;  %493 = vst [vmem:[%s720_s5 + $0x28] sm:$0xff] %v485_v11 }
 0x25d   :  { %492 = vst [vmem:[%s720_s5 + $0x20] sm:$0xff] %v445_v26 }

</bundles_post_ra>
